<compile_context>
chip_gen: v5e
topology: v5e:2x2
jax: 0.10.0
libtpu: 0.0.40
codegen_flags: <defaults>
</compile_context>

<pallas_src>
import jax
import jax.numpy as jnp
from jax.experimental import pallas as pl
from jax.experimental.pallas import tpu as pltpu

SMEM = pltpu.MemorySpace.SMEM


# ----------------------------- Pallas kernels ------------------------------

def _conv_matmul_kernel(p_ref, w_ref, b_ref, a_ref, o_ref, acc_ref):
    """(TM, TK) x (TK, CoP) tiled matmul, K-reduction f32 acc, bias+PReLU, bf16 out.

    NOTE: the output block holds garbage until the final K step; correct only
    while the output BlockSpec index stays (i, 0) across the K axis.
    """
    @pl.when(pl.program_id(1) == 0)
    def _():
        acc_ref[...] = jnp.zeros_like(acc_ref)

    acc_ref[...] += jnp.dot(p_ref[...], w_ref[...],          # bf16 x bf16
                            preferred_element_type=jnp.float32)

    @pl.when(pl.program_id(1) == pl.num_programs(1) - 1)
    def _():
        z = acc_ref[...] + b_ref[...]
        a = a_ref[0, 0]                       # nn.PReLU() single shared slope
        o_ref[...] = jnp.where(z >= 0.0, z, a * z).astype(o_ref.dtype)


def _ypath_kernel(hx_ref, w_ref, y_ref, s_ref, o_ref, acc_ref):
    """acc(B,E) += hx(B,TD) @ W(TD,E); finalize: inv_sigma * sum_E(acc*y) -> (B,1)."""
    @pl.when(pl.program_id(0) == 0)
    def _():
        acc_ref[...] = jnp.zeros_like(acc_ref)

    acc_ref[...] += jnp.dot(hx_ref[...], w_ref[...],          # bf16 x bf16
                            preferred_element_type=jnp.float32)

    @pl.when(pl.program_id(0) == pl.num_programs(0) - 1)
    def _():
        o_ref[...] = s_ref[0, 0] * jnp.sum(acc_ref[...] * y_ref[...],
                                           axis=1, keepdims=True)


def _outconv_kernel(pt_ref, w_ref, y_ref, o_ref):
    """1-channel 3x3 conv as VPU multiply + lane reduce, + per-batch y add.

    pt: (B, N, K) patch tensor (no XLA transpose), w: (1, K) SN weight row,
    y:  (B, 1) per-batch y_output.  Output (B, N) in f32.
    """
    pt = pt_ref[...].astype(jnp.float32)                      # (B, N, K)
    z = jnp.sum(pt * w_ref[...][None], axis=-1)               # (B, N)
    o_ref[...] = z + y_ref[...]                               # broadcast (B,1)


# ------------------------------- glue helpers ------------------------------

def _round_up(x, m):
    return ((x + m - 1) // m) * m


def _choose_tm(m):
    # At least 2 M-blocks whenever M permits so the "parallel" M axis can be
    # sharded across both TensorCores on v7x; multiple of 16 (bf16 sublane
    # packing); cap at 512 rows to keep the (TM, K) bf16 tile small.
    tm = -(-m // 2)
    return min(512, _round_up(max(tm, 16), 16))


def _choose_tk(k, tm, cop):
    # Keep the full (K, CoP) bf16 weight VMEM-resident (constant block index
    # => DMA'd once, reused across every M tile) whenever both it and the
    # (TM, K) bf16 patch tile fit comfortably; otherwise tile K.
    if k * cop * 2 <= 2 * 1024 * 1024 and tm * k * 2 <= 4 * 1024 * 1024:
        return k
    for tk in (2048, 1024, 512, 256, 128):
        if k % tk == 0:
            return tk
    return k


def _choose_td(d):
    if d <= 2048:
        return d
    for td in (2048, 1024, 512):
        if d % td == 0:
            return td
    return 512          # caller pads D to a multiple of 512 (v7x VMEM-safe)


def _im2col_nhwc(x, kh, kw, stride, pad):
    """NHWC -> (B*OH*OW, kh*kw*C) patch matrix, K ordered (kh, kw, c)."""
    B, H, W, C = x.shape
    xp = jnp.pad(x, ((0, 0), (pad, pad), (pad, pad), (0, 0)))
    OH = (H + 2 * pad - kh) // stride + 1
    OW = (W + 2 * pad - kw) // stride + 1
    cols = []
    for i in range(kh):
        for j in range(kw):
            cols.append(xp[:, i:i + stride * OH:stride, j:j + stride * OW:stride, :])
    p = jnp.stack(cols, axis=3)                       # (B, OH, OW, kh*kw, C)
    p = p.reshape(B * OH * OW, kh * kw * C)
    return p, OH, OW


def conv2d_prelu_pallas(x_nhwc, w, b, alpha, stride=2, pad=1):
    """Conv2d(k,s,p) + PReLU in NHWC. Tiled Pallas matmul over (M, K) grid."""
    B = x_nhwc.shape[0]
    Co, Cin, kh, kw = w.shape
    patches, OH, OW = _im2col_nhwc(x_nhwc, kh, kw, stride, pad)
    patches = patches.astype(jnp.bfloat16)            # bf16 HBM stream
    M, K = patches.shape

    CoP = _round_up(Co, 128)                          # lane-dense output stores
    wm = jnp.transpose(w, (2, 3, 1, 0)).reshape(K, Co)      # K ordered (kh,kw,cin)
    wm = jnp.pad(wm, ((0, 0), (0, CoP - Co))).astype(jnp.bfloat16)
    bias = jnp.pad(b, (0, CoP - Co)).reshape(1, CoP).astype(jnp.float32)
    a2d = alpha.reshape(1, 1).astype(jnp.float32)

    TM = _choose_tm(M)
    TK = _choose_tk(K, TM, CoP)
    Mp = _round_up(M, TM)
    if Mp != M:
        patches = jnp.pad(patches, ((0, Mp - M), (0, 0)))

    grid = (Mp // TM, K // TK)
    out = pl.pallas_call(
        _conv_matmul_kernel,
        out_shape=jax.ShapeDtypeStruct((Mp, CoP), jnp.bfloat16),
        grid_spec=pltpu.PrefetchScalarGridSpec(
            num_scalar_prefetch=0,
            grid=grid,
            in_specs=[
                pl.BlockSpec((TM, TK), lambda i, k: (i, k)),
                pl.BlockSpec((TK, CoP), lambda i, k: (k, 0)),
                pl.BlockSpec((1, CoP), lambda i, k: (0, 0)),
                pl.BlockSpec((1, 1), lambda i, k: (0, 0), memory_space=SMEM),
            ],
            out_specs=pl.BlockSpec((TM, CoP), lambda i, k: (i, 0)),
            scratch_shapes=[pltpu.VMEM((TM, CoP), jnp.float32)],
        ),
        compiler_params=pltpu.CompilerParams(
            dimension_semantics=("parallel", "arbitrary"),
            vmem_limit_bytes=48 * 1024 * 1024,        # safe on v7x (64 MiB phys)
        ),
        cost_estimate=pl.CostEstimate(
            flops=2 * Mp * K * CoP,
            transcendentals=0,
            bytes_accessed=Mp * K * 2 + K * CoP * 2 + Mp * CoP * 2,
        ),
    )(patches, wm, bias, a2d)

    return out[:M, :Co].reshape(B, OH, OW, Co)        # stays NHWC, bf16


def ypath_pallas(hx_flat, w_hwc, y, inv_sigma):
    """y_out[b] = inv_sigma * sum_e y[b,e] * (hx_flat @ W)[b,e]; D = reduction grid."""
    B, D = hx_flat.shape
    E = y.shape[1]
    TD = _choose_td(D)
    Dp = _round_up(D, TD)
    hx = hx_flat.astype(jnp.bfloat16)
    wm = w_hwc.astype(jnp.bfloat16)
    if Dp != D:
        hx = jnp.pad(hx, ((0, 0), (0, Dp - D)))
        wm = jnp.pad(wm, ((0, Dp - D), (0, 0)))
    s2d = jnp.asarray(inv_sigma, jnp.float32).reshape(1, 1)

    grid = (Dp // TD,)
    out = pl.pallas_call(
        _ypath_kernel,
        out_shape=jax.ShapeDtypeStruct((B, 1), jnp.float32),
        grid_spec=pltpu.PrefetchScalarGridSpec(
            num_scalar_prefetch=0,
            grid=grid,
            in_specs=[
                pl.BlockSpec((B, TD), lambda d: (0, d)),
                pl.BlockSpec((TD, E), lambda d: (d, 0)),
                pl.BlockSpec((B, E), lambda d: (0, 0)),
                pl.BlockSpec((1, 1), lambda d: (0, 0), memory_space=SMEM),
            ],
            out_specs=pl.BlockSpec((B, 1), lambda d: (0, 0)),
            scratch_shapes=[pltpu.VMEM((B, E), jnp.float32)],
        ),
        compiler_params=pltpu.CompilerParams(
            dimension_semantics=("arbitrary",),
            vmem_limit_bytes=48 * 1024 * 1024,
        ),
    )(hx, wm, y.astype(jnp.float32), s2d)
    return out[:, 0]


def outconv_add_pallas(hx_nhwc, w_out_sn, y_out):
    """3x3 s1 p1 conv to 1 channel (VPU multiply + lane reduce) + y_output add."""
    B, S1, S2, C = hx_nhwc.shape
    patches, OH, OW = _im2col_nhwc(hx_nhwc, 3, 3, 1, 1)       # (B*N, 9C), bf16
    N = OH * OW
    K = patches.shape[1]
    pt = patches.reshape(B, N, K)                             # no transpose copy
    # weight row ordered (kh, kw, cin) to match the patch K layout
    wm = w_out_sn[0].transpose(1, 2, 0).reshape(1, K).astype(jnp.float32)
    y2 = y_out.reshape(B, 1).astype(jnp.float32)

    # Single block over all (B, N) positions.  Output lane width is N (< 128 at
    # demo sizes -> masked stores), negligible at this tensor size.
    out = pl.pallas_call(
        _outconv_kernel,
        out_shape=jax.ShapeDtypeStruct((B, N), jnp.float32),
        grid_spec=pltpu.PrefetchScalarGridSpec(
            num_scalar_prefetch=0,
            grid=(1,),
            in_specs=[
                pl.BlockSpec((B, N, K), lambda i: (0, 0, 0)),
                pl.BlockSpec((1, K), lambda i: (0, 0)),
                pl.BlockSpec((B, 1), lambda i: (0, 0)),
            ],
            out_specs=pl.BlockSpec((B, N), lambda i: (0, 0)),
        ),
        compiler_params=pltpu.CompilerParams(
            dimension_semantics=("arbitrary",),
        ),
    )(pt, wm, y2)

    return out.reshape(B, 1, OH, OW)                          # NCHW final output


def spectral_norm_sigma(w, u, eps=1e-12):
    """One PyTorch-style power-iteration step. w: (out=D, in=E), u: (D,)."""
    v = w.T @ u
    v = v / (jnp.linalg.norm(v) + eps)
    wv = w @ v
    u_new = wv / (jnp.linalg.norm(wv) + eps)
    return jnp.dot(u_new, wv)


# ----------------------------- model definition ----------------------------

def _conv_out_size(n, kernel_size=4, stride=2, padding=1):
    return (n + 2 * padding - kernel_size) // stride + 1


def init_params(key, n_channels, x_size, conv_dim, num_scales, embedding_dim):
    keys = jax.random.split(key, 2 * num_scales + 3)
    ki = 0
    convs = []

    def make_conv(cin, cout):
        nonlocal ki
        w = 0.1 * jax.random.normal(keys[ki], (cout, cin, 4, 4), jnp.float32); ki += 1
        b = 0.1 * jax.random.normal(keys[ki], (cout,), jnp.float32); ki += 1
        alpha = jnp.full((1,), 0.25, jnp.float32)     # nn.PReLU() default
        return (w, b, alpha)

    convs.append(make_conv(n_channels, conv_dim))
    current_dim = conv_dim
    side = _conv_out_size(x_size)
    for _ in range(1, num_scales):
        convs.append(make_conv(current_dim, 2 * current_dim))
        current_dim *= 2
        side = _conv_out_size(side)

    d_flat = current_dim * side * side
    # y_w is stored with its D axis (h, w, c)-major (NHWC flatten order); a
    # PyTorch checkpoint (D ordered (c, h, w)) would need one static permute
    # at load time.  Spectral-norm sigma is permutation-invariant.
    y_w = 0.1 * jax.random.normal(keys[ki], (d_flat, embedding_dim), jnp.float32); ki += 1
    y_u = jax.random.normal(keys[ki], (d_flat,), jnp.float32); ki += 1
    y_u = y_u / (jnp.linalg.norm(y_u) + 1e-12)        # persistent SN power-iter buffer
    out_w = 0.1 * jax.random.normal(keys[ki], (1, current_dim, 3, 3), jnp.float32); ki += 1

    return {"convs": convs, "y_w": y_w, "y_u": y_u, "out_w": out_w}


def ccdiscriminator_forward(params, x, y):
    # External NCHW -> NHWC once; everything downstream is channels-last bf16.
    h = jnp.transpose(x, (0, 2, 3, 1))
    for (w, b, a) in params["convs"]:
        h = conv2d_prelu_pallas(h, w, b, a, stride=2, pad=1)
    # h == h_x in NHWC: (B, s, s, C), bf16
    B = h.shape[0]
    hx_flat = h.reshape(B, -1)                        # (h, w, c)-ordered

    # y_input: spectral-norm Linear (bias=False).  Contraction reordered to
    # (hx @ W) -> (B, E) then an E reduction; 1/sigma folded into the kernel's
    # finalize step, so W/sigma is never materialized.
    sigma = spectral_norm_sigma(params["y_w"], params["y_u"])
    y_out = ypath_pallas(hx_flat, params["y_w"], y, 1.0 / sigma)   # (B,)

    # x_output: spectral-norm 3x3 conv (bias=False).  For a (1, K) weight
    # matrix one power-iteration step gives exactly sigma = ||w||_2.
    w_out = params["out_w"]
    w_out_sn = w_out / (jnp.linalg.norm(w_out.reshape(-1)) + 1e-12)

    return outconv_add_pallas(h, w_out_sn, y_out)     # (B, 1, s, s) NCHW, f32


# ----------------------------------- main -----------------------------------

if __name__ == "__main__":
    n_channels, x_size = 3, 16
    conv_dim, num_scales = 8, 2
    embedding_dim = 8
    B = 2

    key = jax.random.PRNGKey(0)
    pkey, xkey, ykey = jax.random.split(key, 3)
    params = init_params(pkey, n_channels, x_size, conv_dim, num_scales, embedding_dim)

    x = jax.random.normal(xkey, (B, n_channels, x_size, x_size), jnp.float32)
    y = jax.random.normal(ykey, (B, embedding_dim), jnp.float32)

    fwd = jax.jit(ccdiscriminator_forward)
    out = fwd(params, x, y)
    out = jax.block_until_ready(out)

    expected_side = x_size // (2 ** num_scales)
    assert out.shape == (B, 1, expected_side, expected_side), out.shape
    assert jnp.all(jnp.isfinite(out))
    print("KERNEL_OK")
</pallas_src>

<mosaic_0001>
module attributes {stable_mosaic.version = 11 : i64} {
  func.func @_conv_matmul_kernel(%arg0: i32, %arg1: i32, %arg2: memref<64x48xbf16, #tpu.memory_space<vmem>>, %arg3: memref<48x128xbf16, #tpu.memory_space<vmem>>, %arg4: memref<1x128xf32, #tpu.memory_space<vmem>>, %arg5: memref<1x1xf32, #tpu.memory_space<smem>>, %arg6: memref<64x128xbf16, #tpu.memory_space<vmem>>, %arg7: memref<64x128xf32, #tpu.memory_space<vmem>>) attributes {dimension_semantics = [#tpu.dimension_semantics<parallel>, #tpu.dimension_semantics<arbitrary>], iteration_bounds = array<i64: 2, 1>, scalar_prefetch = 0 : i64, scratch_operands = 1 : i64, tpu.core_type = #tpu.core_type<tc>, window_params = [{transform_indices = @transform_0, window_bounds = array<i64: 64, 48>}, {transform_indices = @transform_1, window_bounds = array<i64: 48, 128>}, {pipeline_mode = #tpu.pipeline_mode<synchronous>, transform_indices = @transform_2, window_bounds = array<i64: 1, 128>}, {transform_indices = @transform_3, window_bounds = array<i64: 1, 1>}, {transform_indices = @transform_4, window_bounds = array<i64: 64, 128>}]} {
    %c0_i32 = arith.constant 0 : i32
    %0 = arith.cmpi eq, %arg1, %c0_i32 : i32
    %1 = arith.extui %0 : i1 to i32
    %c0_i32_0 = arith.constant 0 : i32
    %2 = arith.cmpi ne, %1, %c0_i32_0 : i32
    scf.if %2 {
      %cst_10 = arith.constant 0.000000e+00 : f32
      %12 = vector.broadcast %cst_10 : f32 to vector<64x128xf32>
      %c0_11 = arith.constant 0 : index
      %c0_12 = arith.constant 0 : index
      %13 = vector.load %arg7[%c0_11, %c0_12] : memref<64x128xf32, #tpu.memory_space<vmem>>, vector<64x128xf32>
      tpu.vector_store %arg7[%c0_11, %c0_12], %12 {strides = array<i32>} : memref<64x128xf32, #tpu.memory_space<vmem>>, vector<64x128xf32>,
    } else {
    }
    %c0 = arith.constant 0 : index
    %c0_1 = arith.constant 0 : index
    %3 = vector.load %arg7[%c0, %c0_1] : memref<64x128xf32, #tpu.memory_space<vmem>>, vector<64x128xf32>
    %c0_2 = arith.constant 0 : index
    %c0_3 = arith.constant 0 : index
    %4 = vector.load %arg2[%c0_2, %c0_3] : memref<64x48xbf16, #tpu.memory_space<vmem>>, vector<64x48xbf16>
    %c0_4 = arith.constant 0 : index
    %c0_5 = arith.constant 0 : index
    %5 = vector.load %arg3[%c0_4, %c0_5] : memref<48x128xbf16, #tpu.memory_space<vmem>>, vector<48x128xbf16>
    %cst = arith.constant dense<0.000000e+00> : vector<64x128xf32>
    %6 = tpu.matmul %4, %5, %cst {dimension_numbers = #tpu.dot_dimension_numbers<[1], [0], [0], [1], [0, 0, 1, 1], [], []>} : vector<64x48xbf16>, vector<48x128xbf16>, vector<64x128xf32> -> vector<64x128xf32>
    %7 = arith.addf %3, %6 : vector<64x128xf32>
    %c0_6 = arith.constant 0 : index
    %c0_7 = arith.constant 0 : index
    %8 = vector.load %arg7[%c0_6, %c0_7] : memref<64x128xf32, #tpu.memory_space<vmem>>, vector<64x128xf32>
    tpu.vector_store %arg7[%c0_6, %c0_7], %7 {strides = array<i32>} : memref<64x128xf32, #tpu.memory_space<vmem>>, vector<64x128xf32>,
    %c0_i32_8 = arith.constant 0 : i32
    %9 = arith.cmpi eq, %arg1, %c0_i32_8 : i32
    %10 = arith.extui %9 : i1 to i32
    %c0_i32_9 = arith.constant 0 : i32
    %11 = arith.cmpi ne, %10, %c0_i32_9 : i32
    scf.if %11 {
      %c0_10 = arith.constant 0 : index
      %c0_11 = arith.constant 0 : index
      %12 = vector.load %arg7[%c0_10, %c0_11] : memref<64x128xf32, #tpu.memory_space<vmem>>, vector<64x128xf32>
      %c0_12 = arith.constant 0 : index
      %c0_13 = arith.constant 0 : index
      %13 = vector.load %arg4[%c0_12, %c0_13] : memref<1x128xf32, #tpu.memory_space<vmem>>, vector<1x128xf32>
      %14 = vector.broadcast %13 : vector<1x128xf32> to vector<64x128xf32>
      %15 = arith.addf %12, %14 : vector<64x128xf32>
      %c0_14 = arith.constant 0 : index
      %c0_15 = arith.constant 0 : index
      %16 = memref.load %arg5[%c0_14, %c0_15] : memref<1x1xf32, #tpu.memory_space<smem>>
      %cst_16 = arith.constant 0.000000e+00 : f32
      %17 = vector.broadcast %cst_16 : f32 to vector<64x128xf32>
      %18 = arith.cmpf oge, %15, %17 : vector<64x128xf32>
      %19 = vector.broadcast %16 : f32 to vector<64x128xf32>
      %20 = arith.mulf %19, %15 : vector<64x128xf32>
      %21 = arith.select %18, %15, %20 : vector<64x128xi1>, vector<64x128xf32>
      %22 = arith.truncf %21 : vector<64x128xf32> to vector<64x128xbf16>
      %c0_17 = arith.constant 0 : index
      %c0_18 = arith.constant 0 : index
      %23 = vector.load %arg6[%c0_17, %c0_18] : memref<64x128xbf16, #tpu.memory_space<vmem>>, vector<64x128xbf16>
      tpu.vector_store %arg6[%c0_17, %c0_18], %22 {strides = array<i32>} : memref<64x128xbf16, #tpu.memory_space<vmem>>, vector<64x128xbf16>,
    } else {
    }
    return
  }
  func.func @transform_0(%arg0: i32, %arg1: i32) -> (i32, i32) {
    %c0_i32 = arith.constant 0 : i32
    return %arg0, %arg1 : i32, i32
  }
  func.func @transform_1(%arg0: i32, %arg1: i32) -> (i32, i32) {
    %c0_i32 = arith.constant 0 : i32
    %c0_i32_0 = arith.constant 0 : i32
    return %arg1, %c0_i32 : i32, i32
  }
  func.func @transform_2(%arg0: i32, %arg1: i32) -> (i32, i32) {
    %c0_i32 = arith.constant 0 : i32
    %c0_i32_0 = arith.constant 0 : i32
    %c0_i32_1 = arith.constant 0 : i32
    return %c0_i32, %c0_i32_0 : i32, i32
  }
  func.func @transform_3(%arg0: i32, %arg1: i32) -> (i32, i32) {
    %c0_i32 = arith.constant 0 : i32
    %c0_i32_0 = arith.constant 0 : i32
    %c0_i32_1 = arith.constant 0 : i32
    return %c0_i32, %c0_i32_0 : i32, i32
  }
  func.func @transform_4(%arg0: i32, %arg1: i32) -> (i32, i32) {
    %c0_i32 = arith.constant 0 : i32
    %c0_i32_0 = arith.constant 0 : i32
    return %arg0, %c0_i32 : i32, i32
  }
}

module attributes {stable_mosaic.version = 11 : i64} {
  func.func @_conv_matmul_kernel(%arg0: i32, %arg1: i32, %arg2: memref<16x128xbf16, #tpu.memory_space<vmem>>, %arg3: memref<128x128xbf16, #tpu.memory_space<vmem>>, %arg4: memref<1x128xf32, #tpu.memory_space<vmem>>, %arg5: memref<1x1xf32, #tpu.memory_space<smem>>, %arg6: memref<16x128xbf16, #tpu.memory_space<vmem>>, %arg7: memref<16x128xf32, #tpu.memory_space<vmem>>) attributes {dimension_semantics = [#tpu.dimension_semantics<parallel>, #tpu.dimension_semantics<arbitrary>], iteration_bounds = array<i64: 2, 1>, scalar_prefetch = 0 : i64, scratch_operands = 1 : i64, tpu.core_type = #tpu.core_type<tc>, window_params = [{transform_indices = @transform_0, window_bounds = array<i64: 16, 128>}, {transform_indices = @transform_1, window_bounds = array<i64: 128, 128>}, {pipeline_mode = #tpu.pipeline_mode<synchronous>, transform_indices = @transform_2, window_bounds = array<i64: 1, 128>}, {transform_indices = @transform_3, window_bounds = array<i64: 1, 1>}, {transform_indices = @transform_4, window_bounds = array<i64: 16, 128>}]} {
    %c0_i32 = arith.constant 0 : i32
    %0 = arith.cmpi eq, %arg1, %c0_i32 : i32
    %1 = arith.extui %0 : i1 to i32
    %c0_i32_0 = arith.constant 0 : i32
    %2 = arith.cmpi ne, %1, %c0_i32_0 : i32
    scf.if %2 {
      %cst_10 = arith.constant 0.000000e+00 : f32
      %12 = vector.broadcast %cst_10 : f32 to vector<16x128xf32>
      %c0_11 = arith.constant 0 : index
      %c0_12 = arith.constant 0 : index
      %13 = vector.load %arg7[%c0_11, %c0_12] : memref<16x128xf32, #tpu.memory_space<vmem>>, vector<16x128xf32>
      tpu.vector_store %arg7[%c0_11, %c0_12], %12 {strides = array<i32>} : memref<16x128xf32, #tpu.memory_space<vmem>>, vector<16x128xf32>,
    } else {
    }
    %c0 = arith.constant 0 : index
    %c0_1 = arith.constant 0 : index
    %3 = vector.load %arg7[%c0, %c0_1] : memref<16x128xf32, #tpu.memory_space<vmem>>, vector<16x128xf32>
    %c0_2 = arith.constant 0 : index
    %c0_3 = arith.constant 0 : index
    %4 = vector.load %arg2[%c0_2, %c0_3] : memref<16x128xbf16, #tpu.memory_space<vmem>>, vector<16x128xbf16>
    %c0_4 = arith.constant 0 : index
    %c0_5 = arith.constant 0 : index
    %5 = vector.load %arg3[%c0_4, %c0_5] : memref<128x128xbf16, #tpu.memory_space<vmem>>, vector<128x128xbf16>
    %cst = arith.constant dense<0.000000e+00> : vector<16x128xf32>
    %6 = tpu.matmul %4, %5, %cst {dimension_numbers = #tpu.dot_dimension_numbers<[1], [0], [0], [1], [0, 0, 1, 1], [], []>} : vector<16x128xbf16>, vector<128x128xbf16>, vector<16x128xf32> -> vector<16x128xf32>
    %7 = arith.addf %3, %6 : vector<16x128xf32>
    %c0_6 = arith.constant 0 : index
    %c0_7 = arith.constant 0 : index
    %8 = vector.load %arg7[%c0_6, %c0_7] : memref<16x128xf32, #tpu.memory_space<vmem>>, vector<16x128xf32>
    tpu.vector_store %arg7[%c0_6, %c0_7], %7 {strides = array<i32>} : memref<16x128xf32, #tpu.memory_space<vmem>>, vector<16x128xf32>,
    %c0_i32_8 = arith.constant 0 : i32
    %9 = arith.cmpi eq, %arg1, %c0_i32_8 : i32
    %10 = arith.extui %9 : i1 to i32
    %c0_i32_9 = arith.constant 0 : i32
    %11 = arith.cmpi ne, %10, %c0_i32_9 : i32
    scf.if %11 {
      %c0_10 = arith.constant 0 : index
      %c0_11 = arith.constant 0 : index
      %12 = vector.load %arg7[%c0_10, %c0_11] : memref<16x128xf32, #tpu.memory_space<vmem>>, vector<16x128xf32>
      %c0_12 = arith.constant 0 : index
      %c0_13 = arith.constant 0 : index
      %13 = vector.load %arg4[%c0_12, %c0_13] : memref<1x128xf32, #tpu.memory_space<vmem>>, vector<1x128xf32>
      %14 = vector.broadcast %13 : vector<1x128xf32> to vector<16x128xf32>
      %15 = arith.addf %12, %14 : vector<16x128xf32>
      %c0_14 = arith.constant 0 : index
      %c0_15 = arith.constant 0 : index
      %16 = memref.load %arg5[%c0_14, %c0_15] : memref<1x1xf32, #tpu.memory_space<smem>>
      %cst_16 = arith.constant 0.000000e+00 : f32
      %17 = vector.broadcast %cst_16 : f32 to vector<16x128xf32>
      %18 = arith.cmpf oge, %15, %17 : vector<16x128xf32>
      %19 = vector.broadcast %16 : f32 to vector<16x128xf32>
      %20 = arith.mulf %19, %15 : vector<16x128xf32>
      %21 = arith.select %18, %15, %20 : vector<16x128xi1>, vector<16x128xf32>
      %22 = arith.truncf %21 : vector<16x128xf32> to vector<16x128xbf16>
      %c0_17 = arith.constant 0 : index
      %c0_18 = arith.constant 0 : index
      %23 = vector.load %arg6[%c0_17, %c0_18] : memref<16x128xbf16, #tpu.memory_space<vmem>>, vector<16x128xbf16>
      tpu.vector_store %arg6[%c0_17, %c0_18], %22 {strides = array<i32>} : memref<16x128xbf16, #tpu.memory_space<vmem>>, vector<16x128xbf16>,
    } else {
    }
    return
  }
  func.func @transform_0(%arg0: i32, %arg1: i32) -> (i32, i32) {
    %c0_i32 = arith.constant 0 : i32
    return %arg0, %arg1 : i32, i32
  }
  func.func @transform_1(%arg0: i32, %arg1: i32) -> (i32, i32) {
    %c0_i32 = arith.constant 0 : i32
    %c0_i32_0 = arith.constant 0 : i32
    return %arg1, %c0_i32 : i32, i32
  }
  func.func @transform_2(%arg0: i32, %arg1: i32) -> (i32, i32) {
    %c0_i32 = arith.constant 0 : i32
    %c0_i32_0 = arith.constant 0 : i32
    %c0_i32_1 = arith.constant 0 : i32
    return %c0_i32, %c0_i32_0 : i32, i32
  }
  func.func @transform_3(%arg0: i32, %arg1: i32) -> (i32, i32) {
    %c0_i32 = arith.constant 0 : i32
    %c0_i32_0 = arith.constant 0 : i32
    %c0_i32_1 = arith.constant 0 : i32
    return %c0_i32, %c0_i32_0 : i32, i32
  }
  func.func @transform_4(%arg0: i32, %arg1: i32) -> (i32, i32) {
    %c0_i32 = arith.constant 0 : i32
    %c0_i32_0 = arith.constant 0 : i32
    return %arg0, %c0_i32 : i32, i32
  }
}

module attributes {stable_mosaic.version = 11 : i64} {
  func.func @_ypath_kernel(%arg0: i32, %arg1: memref<2x256xbf16, #tpu.memory_space<vmem>>, %arg2: memref<256x8xbf16, #tpu.memory_space<vmem>>, %arg3: memref<2x8xf32, #tpu.memory_space<vmem>>, %arg4: memref<1x1xf32, #tpu.memory_space<smem>>, %arg5: memref<2x1xf32, #tpu.memory_space<vmem>>, %arg6: memref<2x8xf32, #tpu.memory_space<vmem>>) attributes {dimension_semantics = [#tpu.dimension_semantics<arbitrary>], iteration_bounds = array<i64: 1>, scalar_prefetch = 0 : i64, scratch_operands = 1 : i64, tpu.core_type = #tpu.core_type<tc>, window_params = [{transform_indices = @transform_0, window_bounds = array<i64: 2, 256>}, {transform_indices = @transform_1, window_bounds = array<i64: 256, 8>}, {pipeline_mode = #tpu.pipeline_mode<synchronous>, transform_indices = @transform_2, window_bounds = array<i64: 2, 8>}, {transform_indices = @transform_3, window_bounds = array<i64: 1, 1>}, {pipeline_mode = #tpu.pipeline_mode<synchronous>, transform_indices = @transform_4, window_bounds = array<i64: 2, 1>}]} {
    %c0_i32 = arith.constant 0 : i32
    %0 = arith.cmpi eq, %arg0, %c0_i32 : i32
    %1 = arith.extui %0 : i1 to i32
    %c0_i32_0 = arith.constant 0 : i32
    %2 = arith.cmpi ne, %1, %c0_i32_0 : i32
    scf.if %2 {
      %cst_10 = arith.constant 0.000000e+00 : f32
      %12 = vector.broadcast %cst_10 : f32 to vector<2x8xf32>
      %c0_11 = arith.constant 0 : index
      %c0_12 = arith.constant 0 : index
      %13 = vector.load %arg6[%c0_11, %c0_12] : memref<2x8xf32, #tpu.memory_space<vmem>>, vector<2x8xf32>
      tpu.vector_store %arg6[%c0_11, %c0_12], %12 {strides = array<i32>} : memref<2x8xf32, #tpu.memory_space<vmem>>, vector<2x8xf32>,
    } else {
    }
    %c0 = arith.constant 0 : index
    %c0_1 = arith.constant 0 : index
    %3 = vector.load %arg6[%c0, %c0_1] : memref<2x8xf32, #tpu.memory_space<vmem>>, vector<2x8xf32>
    %c0_2 = arith.constant 0 : index
    %c0_3 = arith.constant 0 : index
    %4 = vector.load %arg1[%c0_2, %c0_3] : memref<2x256xbf16, #tpu.memory_space<vmem>>, vector<2x256xbf16>
    %c0_4 = arith.constant 0 : index
    %c0_5 = arith.constant 0 : index
    %5 = vector.load %arg2[%c0_4, %c0_5] : memref<256x8xbf16, #tpu.memory_space<vmem>>, vector<256x8xbf16>
    %cst = arith.constant dense<0.000000e+00> : vector<2x8xf32>
    %6 = tpu.matmul %4, %5, %cst {dimension_numbers = #tpu.dot_dimension_numbers<[1], [0], [0], [1], [0, 0, 1, 1], [], []>} : vector<2x256xbf16>, vector<256x8xbf16>, vector<2x8xf32> -> vector<2x8xf32>
    %7 = arith.addf %3, %6 : vector<2x8xf32>
    %c0_6 = arith.constant 0 : index
    %c0_7 = arith.constant 0 : index
    %8 = vector.load %arg6[%c0_6, %c0_7] : memref<2x8xf32, #tpu.memory_space<vmem>>, vector<2x8xf32>
    tpu.vector_store %arg6[%c0_6, %c0_7], %7 {strides = array<i32>} : memref<2x8xf32, #tpu.memory_space<vmem>>, vector<2x8xf32>,
    %c0_i32_8 = arith.constant 0 : i32
    %9 = arith.cmpi eq, %arg0, %c0_i32_8 : i32
    %10 = arith.extui %9 : i1 to i32
    %c0_i32_9 = arith.constant 0 : i32
    %11 = arith.cmpi ne, %10, %c0_i32_9 : i32
    scf.if %11 {
      %c0_10 = arith.constant 0 : index
      %c0_11 = arith.constant 0 : index
      %12 = memref.load %arg4[%c0_10, %c0_11] : memref<1x1xf32, #tpu.memory_space<smem>>
      %c0_12 = arith.constant 0 : index
      %c0_13 = arith.constant 0 : index
      %13 = vector.load %arg6[%c0_12, %c0_13] : memref<2x8xf32, #tpu.memory_space<vmem>>, vector<2x8xf32>
      %c0_14 = arith.constant 0 : index
      %c0_15 = arith.constant 0 : index
      %14 = vector.load %arg3[%c0_14, %c0_15] : memref<2x8xf32, #tpu.memory_space<vmem>>, vector<2x8xf32>
      %15 = arith.mulf %13, %14 : vector<2x8xf32>
      %cst_16 = arith.constant dense<0.000000e+00> : vector<2xf32>
      %16 = vector.multi_reduction <add>, %15, %cst_16 [1] : vector<2x8xf32> to vector<2xf32>
      %17 = vector.shape_cast %16 : vector<2xf32> to vector<2x1xf32>
      %18 = vector.broadcast %12 : f32 to vector<2x1xf32>
      %19 = arith.mulf %18, %17 : vector<2x1xf32>
      %c0_17 = arith.constant 0 : index
      %c0_18 = arith.constant 0 : index
      %20 = vector.load %arg5[%c0_17, %c0_18] : memref<2x1xf32, #tpu.memory_space<vmem>>, vector<2x1xf32>
      tpu.vector_store %arg5[%c0_17, %c0_18], %19 {strides = array<i32>} : memref<2x1xf32, #tpu.memory_space<vmem>>, vector<2x1xf32>,
    } else {
    }
    return
  }
  func.func @transform_0(%arg0: i32) -> (i32, i32) {
    %c0_i32 = arith.constant 0 : i32
    %c0_i32_0 = arith.constant 0 : i32
    return %c0_i32, %arg0 : i32, i32
  }
  func.func @transform_1(%arg0: i32) -> (i32, i32) {
    %c0_i32 = arith.constant 0 : i32
    %c0_i32_0 = arith.constant 0 : i32
    return %arg0, %c0_i32 : i32, i32
  }
  func.func @transform_2(%arg0: i32) -> (i32, i32) {
    %c0_i32 = arith.constant 0 : i32
    %c0_i32_0 = arith.constant 0 : i32
    %c0_i32_1 = arith.constant 0 : i32
    return %c0_i32, %c0_i32_0 : i32, i32
  }
  func.func @transform_3(%arg0: i32) -> (i32, i32) {
    %c0_i32 = arith.constant 0 : i32
    %c0_i32_0 = arith.constant 0 : i32
    %c0_i32_1 = arith.constant 0 : i32
    return %c0_i32, %c0_i32_0 : i32, i32
  }
  func.func @transform_4(%arg0: i32) -> (i32, i32) {
    %c0_i32 = arith.constant 0 : i32
    %c0_i32_0 = arith.constant 0 : i32
    %c0_i32_1 = arith.constant 0 : i32
    return %c0_i32, %c0_i32_0 : i32, i32
  }
}

module attributes {stable_mosaic.version = 11 : i64} {
  func.func @_outconv_kernel(%arg0: i32, %arg1: memref<2x16x144xbf16, #tpu.memory_space<vmem>>, %arg2: memref<1x144xf32, #tpu.memory_space<vmem>>, %arg3: memref<2x1xf32, #tpu.memory_space<vmem>>, %arg4: memref<2x16xf32, #tpu.memory_space<vmem>>) attributes {dimension_semantics = [#tpu.dimension_semantics<arbitrary>], iteration_bounds = array<i64: 1>, scalar_prefetch = 0 : i64, scratch_operands = 0 : i64, tpu.core_type = #tpu.core_type<tc>, window_params = [{pipeline_mode = #tpu.pipeline_mode<synchronous>, transform_indices = @transform_0, window_bounds = array<i64: 2, 16, 144>}, {pipeline_mode = #tpu.pipeline_mode<synchronous>, transform_indices = @transform_1, window_bounds = array<i64: 1, 144>}, {pipeline_mode = #tpu.pipeline_mode<synchronous>, transform_indices = @transform_2, window_bounds = array<i64: 2, 1>}, {pipeline_mode = #tpu.pipeline_mode<synchronous>, transform_indices = @transform_3, window_bounds = array<i64: 2, 16>}]} {
    %c0 = arith.constant 0 : index
    %c0_0 = arith.constant 0 : index
    %c0_1 = arith.constant 0 : index
    %0 = vector.load %arg1[%c0, %c0_0, %c0_1] : memref<2x16x144xbf16, #tpu.memory_space<vmem>>, vector<2x16x144xbf16>
    %1 = arith.extf %0 : vector<2x16x144xbf16> to vector<2x16x144xf32>
    %c0_2 = arith.constant 0 : index
    %c0_3 = arith.constant 0 : index
    %2 = vector.load %arg2[%c0_2, %c0_3] : memref<1x144xf32, #tpu.memory_space<vmem>>, vector<1x144xf32>
    %3 = vector.shape_cast %2 : vector<1x144xf32> to vector<1x1x144xf32>
    %4 = vector.broadcast %3 : vector<1x1x144xf32> to vector<2x16x144xf32>
    %5 = arith.mulf %1, %4 : vector<2x16x144xf32>
    %cst = arith.constant dense<0.000000e+00> : vector<2x16xf32>
    %6 = vector.multi_reduction <add>, %5, %cst [2] : vector<2x16x144xf32> to vector<2x16xf32>
    %c0_4 = arith.constant 0 : index
    %c0_5 = arith.constant 0 : index
    %7 = vector.load %arg3[%c0_4, %c0_5] : memref<2x1xf32, #tpu.memory_space<vmem>>, vector<2x1xf32>
    %8 = vector.broadcast %7 : vector<2x1xf32> to vector<2x16xf32>
    %9 = arith.addf %6, %8 : vector<2x16xf32>
    %c0_6 = arith.constant 0 : index
    %c0_7 = arith.constant 0 : index
    %10 = vector.load %arg4[%c0_6, %c0_7] : memref<2x16xf32, #tpu.memory_space<vmem>>, vector<2x16xf32>
    tpu.vector_store %arg4[%c0_6, %c0_7], %9 {strides = array<i32>} : memref<2x16xf32, #tpu.memory_space<vmem>>, vector<2x16xf32>,
    return
  }
  func.func @transform_0(%arg0: i32) -> (i32, i32, i32) {
    %c0_i32 = arith.constant 0 : i32
    %c0_i32_0 = arith.constant 0 : i32
    %c0_i32_1 = arith.constant 0 : i32
    %c0_i32_2 = arith.constant 0 : i32
    return %c0_i32, %c0_i32_0, %c0_i32_1 : i32, i32, i32
  }
  func.func @transform_1(%arg0: i32) -> (i32, i32) {
    %c0_i32 = arith.constant 0 : i32
    %c0_i32_0 = arith.constant 0 : i32
    %c0_i32_1 = arith.constant 0 : i32
    return %c0_i32, %c0_i32_0 : i32, i32
  }
  func.func @transform_2(%arg0: i32) -> (i32, i32) {
    %c0_i32 = arith.constant 0 : i32
    %c0_i32_0 = arith.constant 0 : i32
    %c0_i32_1 = arith.constant 0 : i32
    return %c0_i32, %c0_i32_0 : i32, i32
  }
  func.func @transform_3(%arg0: i32) -> (i32, i32) {
    %c0_i32 = arith.constant 0 : i32
    %c0_i32_0 = arith.constant 0 : i32
    %c0_i32_1 = arith.constant 0 : i32
    return %c0_i32, %c0_i32_0 : i32, i32
  }
}

</mosaic_0001>

<bundles_post_ra>
// kernel: ccdiscriminator_forward.4
= control target key start
LH: loop header
LB: loop body
LE: loop exit
PB: predicated region body
PF: predicated region fallthrough
CT: control target
= control target key end

     0   :  { %s686_s17 = smov 0   ;;  %s688_s18 = smov 0   ;;  %s738_s0 = inlined_call_operand.vmem [shape: bf16[128,48], index: 0, kind: input, shape index: {}]   ;;  %s739_s1 = inlined_call_operand.vmem [shape: bf16[48,128], index: 1, kind: input, shape index: {}]   ;;  %s740_s2 = inlined_call_operand.vmem [shape: f32[1,128], index: 2, kind: input, shape index: {}]   ;;  %s741_s3 = inlined_call_operand.<no memory space> [shape: f32[1,1], index: 3, kind: input, shape index: {}]   ;;  %s742_s4 = inlined_call_operand.vmem [shape: bf16[128,128], index: 4, kind: output, shape index: {}]  }
   0x1   :  { %9 = sst [smem:[#allocation3]] %s741_s3  ;;  %s690_s19 = smov 0  }
   0x2 LB: > { %s27_s3 = sadd.s32 1, %s652_s18  ;;  %p531_p0 = scmp.ge.s32.totalorder %s656_s19, 1  ;;  %s656_s19 = sphi %s690_s19, %s15_s19   ;;  %s652_s18 = sphi %s688_s18, %s744_s18   ;;  %s648_s17 = sphi %s686_s17, %s743_s17  }
   0x3   : > { %p29_p1 = scmp.ge.s32.totalorder %s27_s3, 2  ;;  %p192_p2 = scmp.lt.s32.totalorder %s656_s19, 3 }
   0x5   : > { %s746_s3 = smov (%p29_p1, %s27_s3), 0  ;;  %p193_p3 = pnand %p531_p0, %p192_p2 }
   0x6   : > { %s532_s22 = sshll.u32 (!%p193_p3), %s648_s17, 3  ;;  %s401_s5 = sld [smem:[#allocation3]] (!%p193_p3) }
   0x7   : > { %196 = sbr.rel (%p193_p3) target bundleno = 174 (0xae), region = 36  ;;  %p227_p4 = scmp.lt.s32.totalorder (!%p193_p3), %s532_s22, 15 }
   0xc   : > { %v576_v0 = vld [vmem:[%s739_s1 + $0x10] sm:$0xff]  ;;  %v575_v1 = vld [vmem:[%s739_s1 + $0x8] sm:$0xff]  ;;  %s748_s22 = smov (!%p227_p4, %s532_s22), 15  ;;  %v574_v2 = vld [vmem:[%s739_s1] sm:$0xff]  ;;  %vm320_vm0 = vcmask 392192   ;;  %v410_v12 = vstv %s401_s5 }
   0xd   : > { %338 = vmatpush.bf16.msra.mxu0 %v576_v0  ;;  %600 = vmatpush.bf16.msra.mxu1 %v576_v0  ;;  %s533_s25 = sshll.u32 %s748_s22, 2  ;;  %v633_v9 = vld [vmem:[%s740_s2] ss:$0 sm:$0xff] }
   0xe   : > { %601 = vmatpush.bf16.msra.mxu2 %v576_v0  ;;  %602 = vmatpush.bf16.msra.mxu3 %v576_v0  ;;  %s233_s30 = scalar_lea.vmem %s738_s0, %s533_s25  ;;  %s245_s10 = scalar_lea.vmem %s742_s4, %s533_s25 }
   0xf   : > { %v570_v3 = vld [vmem:[%s233_s30] sm:$0xff]  ;;  %v571_v4 = vld [vmem:[%s233_s30 + $0x8] sm:$0xff]  ;;  %v572_v5 = vld [vmem:[%s233_s30 + $0x10] sm:$0xff] }
  0x10   : > { %v573_v6 = vld [vmem:[%s233_s30 + $0x18] sm:$0xff] }
  0x11   : > { %339 = vmatpush.bf16.msra.mxu0 %v575_v1  ;;  %603 = vmatpush.bf16.msra.mxu1 %v575_v1 }
  0x12   : > { %604 = vmatpush.bf16.msra.mxu2 %v575_v1  ;;  %605 = vmatpush.bf16.msra.mxu3 %v575_v1 }
  0x15   : > { %340 = vmatpush.bf16.msra.mxu0 %v574_v2  ;;  %606 = vmatpush.bf16.msra.mxu1 %v574_v2 }
  0x16   : > { %607 = vmatpush.bf16.msra.mxu2 %v574_v2  ;;  %608 = vmatpush.bf16.msra.mxu3 %v574_v2 }
  0x18   : > { %564 = vmatmul.msk.bf16.vlgmr.msra.gmra.mxu0 %vm320_vm0, %v570_v3  ;;  %565 = vmatmul.msk.bf16.vlgmr.msra.gmra.mxu1 %vm320_vm0, %v571_v4 }
  0x19   : > { %566 = vmatmul.msk.bf16.vlgmr.msra.gmra.mxu2 %vm320_vm0, %v572_v5  ;;  %567 = vmatmul.msk.bf16.vlgmr.msra.gmra.mxu3 %vm320_vm0, %v573_v6 }
  0x95   : > { %v342_v7 = vpop.f32.mrf.mxu0  ;;  %v347_v8 = vpop.f32.mrf.mxu1 }
  0x96   : > { %v393_v10 = vadd.f32 %v633_v9, %v342_v7  ;;  %v395_v11 = vadd.f32 %v633_v9, %v347_v8 }
  0x98   : > { %v411_v17 = vmul.f32 %v410_v12, %v393_v10  ;;  %v413_v18 = vmul.f32 %v410_v12, %v395_v11  ;;  %vm402_vm1 = vcmp.ge.f32.partialorder %v393_v10, 0.0  ;;  %vm404_vm2 = vcmp.ge.f32.partialorder %v395_v11, 0.0 }
  0x9a   : > { %v419_v25 = vsel %vm402_vm1, %v393_v10, %v411_v17  ;;  %v421_v26 = vsel %vm404_vm2, %v395_v11, %v413_v18 }
  0x9c   : > { %v352_v13 = vpop.f32.mrf.mxu2  ;;  %v357_v14 = vpop.f32.mrf.mxu3 }
  0x9d   : > { %v344_v15 = vpop.f32.mrf.mxu0  ;;  %v349_v16 = vpop.f32.mrf.mxu1  ;;  %v397_v23 = vadd.f32 %v633_v9, %v352_v13  ;;  %v399_v24 = vadd.f32 %v633_v9, %v357_v14 }
  0x9e   : > { %v394_v19 = vadd.f32 %v633_v9, %v344_v15  ;;  %v396_v20 = vadd.f32 %v633_v9, %v349_v16 }
  0x9f   : > { %v415_v33 = vmul.f32 %v410_v12, %v397_v23  ;;  %v417_v34 = vmul.f32 %v410_v12, %v399_v24  ;;  %vm406_vm5 = vcmp.ge.f32.partialorder %v397_v23, 0.0  ;;  %vm408_vm6 = vcmp.ge.f32.partialorder %v399_v24, 0.0 }
  0xa0   : > { %vm403_vm3 = vcmp.ge.f32.partialorder %v394_v19, 0.0  ;;  %v412_v21 = vmul.f32 %v410_v12, %v394_v19  ;;  %vm405_vm4 = vcmp.ge.f32.partialorder %v396_v20, 0.0  ;;  %v414_v22 = vmul.f32 %v410_v12, %v396_v20 }
  0xa1   : > { %v423_v39 = vsel %vm406_vm5, %v397_v23, %v415_v33  ;;  %v425_v40 = vsel %vm408_vm6, %v399_v24, %v417_v34 }
  0xa2   : > { %v420_v27 = vsel %vm403_vm3, %v394_v19, %v412_v21  ;;  %v422_v28 = vsel %vm405_vm4, %v396_v20, %v414_v22 }
  0xa3   : > { %v580_v29 = vpack.c.bf16 %v420_v27, %v419_v25  ;;  %v585_v30 = vpack.c.bf16 %v422_v28, %v421_v26 }
  0xa4   : > { %v354_v31 = vpop.f32.mrf.mxu2  ;;  %v359_v32 = vpop.f32.mrf.mxu3 }
  0xa5   : > { %581 = vst [vmem:[%s245_s10] sm:$0xff] %v580_v29   ;;  %v398_v35 = vadd.f32 %v633_v9, %v354_v31  ;;  %v400_v36 = vadd.f32 %v633_v9, %v359_v32 }
  0xa6   : > { %597 = vst [vmem:[%s245_s10 + $0x8] sm:$0xff] %v585_v30  }
  0xa7   : > { %vm407_vm7 = vcmp.ge.f32.partialorder %v398_v35, 0.0  ;;  %v416_v37 = vmul.f32 %v410_v12, %v398_v35  ;;  %vm409_vm8 = vcmp.ge.f32.partialorder %v400_v36, 0.0  ;;  %v418_v38 = vmul.f32 %v410_v12, %v400_v36 }
  0xa9   : > { %v424_v41 = vsel %vm407_vm7, %v398_v35, %v416_v37  ;;  %v426_v42 = vsel %vm409_vm8, %v400_v36, %v418_v38 }
  0xaa   : > { %v590_v43 = vpack.c.bf16 %v424_v41, %v423_v39  ;;  %v595_v44 = vpack.c.bf16 %v426_v42, %v425_v40 }
  0xac   : > { %598 = vst [vmem:[%s245_s10 + $0x10] sm:$0xff] %v590_v43  }
  0xad   : > { %599 = vst [vmem:[%s245_s10 + $0x18] sm:$0xff] %v595_v44  }
  0xae PF: > { %s15_s19 = sadd.s32 1, %s656_s19   ;;  %s743_s17 = smov %s652_s18 }
  0xaf   : > { %p12_p5 = scmp.ge.s32.totalorder %s15_s19, 4   ;;  %s744_s18 = smov %s746_s3 }
  0xb1   :  { %14 = sbr.rel (!%p12_p5) target bundleno = 2 (0x2), region = 77 }

// kernel: ccdiscriminator_forward.5
= control target key start
LH: loop header
LB: loop body
LE: loop exit
PB: predicated region body
PF: predicated region fallthrough
CT: control target
= control target key end

     0   :  { %s590_s17 = smov 0   ;;  %s592_s18 = smov 0   ;;  %s650_s0 = inlined_call_operand.vmem [shape: bf16[32,128], index: 0, kind: input, shape index: {}]   ;;  %s651_s1 = inlined_call_operand.vmem [shape: bf16[128,128], index: 1, kind: input, shape index: {}]   ;;  %s652_s2 = inlined_call_operand.vmem [shape: f32[1,128], index: 2, kind: input, shape index: {}]   ;;  %s653_s3 = inlined_call_operand.<no memory space> [shape: f32[1,1], index: 3, kind: input, shape index: {}]   ;;  %s654_s4 = inlined_call_operand.vmem [shape: bf16[32,128], index: 4, kind: output, shape index: {}]  }
   0x1   :  { %9 = sst [smem:[#allocation3]] %s653_s3  ;;  %s594_s19 = smov 0  }
   0x2 LB: > { %s27_s3 = sadd.s32 1, %s556_s18  ;;  %p456_p0 = scmp.ge.s32.totalorder %s560_s19, 1  ;;  %s560_s19 = sphi %s594_s19, %s15_s19   ;;  %s556_s18 = sphi %s592_s18, %s656_s18   ;;  %s552_s17 = sphi %s590_s17, %s655_s17  }
   0x3   : > { %p29_p1 = scmp.ge.s32.totalorder %s27_s3, 2  ;;  %p192_p2 = scmp.lt.s32.totalorder %s560_s19, 3 }
   0x5   : > { %s658_s3 = smov (%p29_p1, %s27_s3), 0  ;;  %p193_p3 = pnand %p456_p0, %p192_p2 }
   0x6   : > { %s457_s28 = sshll.u32 (!%p193_p3), %s552_s17, 1  ;;  %s356_s15 = sld [smem:[#allocation3]] (!%p193_p3) }
   0x7   : > { %196 = sbr.rel (%p193_p3) target bundleno = 186 (0xba), region = 36  ;;  %p227_p4 = scmp.lt.s32.totalorder (!%p193_p3), %s457_s28, 3 }
   0xc   : > { %v507_v0 = vld [vmem:[%s651_s1 + $0x38] sm:$0xff]  ;;  %v506_v1 = vld [vmem:[%s651_s1 + $0x30] sm:$0xff]  ;;  %v505_v2 = vld [vmem:[%s651_s1 + $0x28] sm:$0xff]  ;;  %s660_s28 = smov (!%p227_p4, %s457_s28), 3  ;;  %v359_v12 = vstv %s356_s15 }
   0xd   : > { %327 = vmatpush.bf16.msra.mxu0 %v507_v0  ;;  %v504_v3 = vld [vmem:[%s651_s1 + $0x20] sm:$0xff]  ;;  %v503_v4 = vld [vmem:[%s651_s1 + $0x18] sm:$0xff]  ;;  %v502_v5 = vld [vmem:[%s651_s1 + $0x10] sm:$0xff]  ;;  %s458_s9 = sshll.u32 %s660_s28, 2 }
   0xe   : > { %v501_v6 = vld [vmem:[%s651_s1 + $0x8] sm:$0xff]  ;;  %v500_v7 = vld [vmem:[%s651_s1] sm:$0xff]  ;;  %s233_s14 = scalar_lea.vmem %s650_s0, %s458_s9  ;;  %s245_s22 = scalar_lea.vmem %s654_s4, %s458_s9 }
   0xf   : > { %v499_v8 = vld [vmem:[%s233_s14] sm:$0xff] }
  0x10   : > { %v537_v10 = vld [vmem:[%s652_s2] ss:$0 sm:$0xff] }
  0x11   : > { %328 = vmatpush.bf16.msra.mxu0 %v506_v1 }
  0x15   : > { %329 = vmatpush.bf16.msra.mxu0 %v505_v2 }
  0x19   : > { %330 = vmatpush.bf16.msra.mxu0 %v504_v3 }
  0x1d   : > { %331 = vmatpush.bf16.msra.mxu0 %v503_v4 }
  0x21   : > { %332 = vmatpush.bf16.msra.mxu0 %v502_v5 }
  0x25   : > { %333 = vmatpush.bf16.msra.mxu0 %v501_v6 }
  0x29   : > { %334 = vmatpush.bf16.msra.mxu0 %v500_v7 }
  0x2c   : > { %335 = vmatmul.bf16.vlgmr.msra.gmra.mxu0 %v499_v8 }
  0xa9   : > { %v336_v9 = vpop.f32.mrf.mxu0 }
  0xaa   : > { %v354_v11 = vadd.f32 %v537_v10, %v336_v9 }
  0xac   : > { %v360_v14 = vmul.f32 %v359_v12, %v354_v11  ;;  %vm357_vm0 = vcmp.ge.f32.partialorder %v354_v11, 0.0 }
  0xae   : > { %v362_v17 = vsel %vm357_vm0, %v354_v11, %v360_v14 }
  0xb1   : > { %v338_v13 = vpop.f32.mrf.mxu0 }
  0xb2   : > { %v355_v15 = vadd.f32 %v537_v10, %v338_v13 }
  0xb4   : > { %vm358_vm1 = vcmp.ge.f32.partialorder %v355_v15, 0.0  ;;  %v361_v16 = vmul.f32 %v359_v12, %v355_v15 }
  0xb6   : > { %v363_v18 = vsel %vm358_vm1, %v355_v15, %v361_v16 }
  0xb7   : > { %v511_v19 = vpack.c.bf16 %v363_v18, %v362_v17 }
  0xb9   : > { %512 = vst [vmem:[%s245_s22] sm:$0xff] %v511_v19  }
  0xba PF: > { %s15_s19 = sadd.s32 1, %s560_s19   ;;  %s655_s17 = smov %s556_s18 }
  0xbb   : > { %p12_p5 = scmp.ge.s32.totalorder %s15_s19, 4   ;;  %s656_s18 = smov %s658_s3 }
  0xbd   :  { %14 = sbr.rel (!%p12_p5) target bundleno = 2 (0x2), region = 77 }

// kernel: ccdiscriminator_forward.7
= control target key start
LH: loop header
LB: loop body
LE: loop exit
PB: predicated region body
PF: predicated region fallthrough
CT: control target
= control target key end

     0   :  { %v109_v0 = vmov 0   ;;  %vm40_vm0 = vcmask 130048   ;;  %v86_v45 = vlaneseq  ;;  %vm91_vm1 = vcmask 130112   ;;  %s155_s2 = inlined_call_operand.vmem [shape: f32[2,1], index: 2, kind: input, shape index: {}]   ;;  %s156_s0 = inlined_call_operand.vmem [shape: bf16[2,16,144], index: 0, kind: input, shape index: {}]   ;;  %s157_s1 = inlined_call_operand.vmem [shape: f32[1,144], index: 1, kind: input, shape index: {}]   ;;  %s158_s3 = inlined_call_operand.vmem [shape: f32[2,16], index: 3, kind: output, shape index: {}]  }
   0x1   :  { %106 = vset.pattern.permute.xlu0 %v109_v0  ;;  %v57_v1 = vld [vmem:[%s155_s2] sm:$0x3]  ;;  %v17_v2 = vld [vmem:[%s156_s0 + $0x18] sm:$0xff]  ;;  %108 = vset.pattern.permute.xlu1 %v109_v0  ;;  %v15_v8 = vld [vmem:[%s156_s0 + $0x8] sm:$0xff]  ;;  %vm96_vm2 = vcmask 1041409   ;;  %vm99_vm3 = vcmask 123904  }
   0x2   :  { %v26_v3 = vld [vmem:[%s157_s1] sm:$0x3]  ;;  %60 = vperm.xlu0 %106, %v57_v1   ;;  %v24_v4 = vunpack.c.l.bf16 %v17_v2  ;;  %v25_v5 = vunpack.c.h.bf16 %v17_v2  ;;  %v16_v9 = vld [vmem:[%s156_s0 + $0x10] sm:$0xff]  ;;  %107 = vset.pattern.permute.xlu2 %v109_v0  ;;  %v20_v10 = vunpack.c.l.bf16 %v15_v8  ;;  %v21_v11 = vunpack.c.h.bf16 %v15_v8 }
   0x3   :  { %v28_v6 = vperm.slane %v26_v3, 0  ;;  %v29_v7 = vperm.slane %v26_v3, 1  ;;  %v23_v12 = vunpack.c.h.bf16 %v16_v9  ;;  %v22_v18 = vunpack.c.l.bf16 %v16_v9  ;;  %v14_v26 = vld [vmem:[%s156_s0] sm:$0xff] }
   0x4   :  { %v19_v27 = vunpack.c.h.bf16 %v14_v26  ;;  %v18_v28 = vunpack.c.l.bf16 %v14_v26  ;;  %v87_v47 = vand.u32 127, %v86_v45 }
   0x5   :  { %v38_v13 = vmul.f32 %v28_v6, %v24_v4  ;;  %v39_v14 = vmul.f32 %v29_v7, %v25_v5  ;;  %v34_v15 = vmul.f32 %v28_v6, %v20_v10  ;;  %v35_v16 = vmul.f32 %v29_v7, %v21_v11 }
   0x6   :  { %v37_v21 = vmul.f32 %v29_v7, %v23_v12  ;;  %v36_v23 = vmul.f32 %v28_v6, %v22_v18  ;;  %v33_v29 = vmul.f32 %v29_v7, %v19_v27  ;;  %v32_v30 = vmul.f32 %v28_v6, %v18_v28 }
   0x7   :  { %v53_v17 = vsel %vm40_vm0, %v39_v14, 0.0  ;;  %v45_v20 = vsel %vm40_vm0, %v35_v16, 0.0  ;;  %v89_v48 = vadd.s32 4294967288, %v87_v47 }
   0x8   :  { %v54_v19 = vadd.f32 %v53_v17, %v38_v13  ;;  %v46_v22 = vadd.f32 %v45_v20, %v34_v15  ;;  %v49_v24 = vsel %vm40_vm0, %v37_v21, 0.0  ;;  %v41_v31 = vsel %vm40_vm0, %v33_v29, 0.0 }
   0x9   :  { %v50_v25 = vadd.f32 %v49_v24, %v36_v23  ;;  %v42_v32 = vadd.f32 %v41_v31, %v32_v30 }
   0xa   :  { %55 = vadd.xlane.f32.xlu2 %v54_v19  ;;  %47 = vadd.xlane.f32.xlu1 %v46_v22 }
  0x12   :  { %51 = vadd.xlane.f32.xlu1 %v50_v25 }
  0x2c   :  { %43 = vadd.xlane.f32.xlu0 %v42_v32 }
  0x74   :  { %v61_v33 = vpop.permute.xlu0 %60 }
  0x75   :  { %v62_v34 = vperm.slane %v61_v33, 0  ;;  %v63_v40 = vperm.slane %v61_v33, 1 }
  0x7d   :  { %v48_v35 = vpop.xlane.xlu1 %47  ;;  %v56_v42 = vpop.xlane.xlu2 %55 }
  0x7e   :  { %v67_v36 = vadd.f32 %v62_v34, %v48_v35  ;;  %v69_v43 = vadd.f32 %v63_v40, %v56_v42 }
  0x80   :  { %78 = vperm.xlu1 %108, %v67_v36  }
  0x85   :  { %v52_v39 = vpop.xlane.xlu1 %51 }
  0x86   :  { %v68_v41 = vadd.f32 %v63_v40, %v52_v39 }
  0x9f   :  { %v44_v37 = vpop.xlane.xlu0 %43 }
  0xa0   :  { %v66_v38 = vadd.f32 %v62_v34, %v44_v37 }
  0xa2   :  { %75 = vperm.xlu2 %107, %v66_v38  }
  0xaa   :  { %81 = vperm.xlu2 %107, %v68_v41  }
  0xb2   :  { %84 = vperm.xlu2 %107, %v69_v43  }
  0xf2   :  { %v79_v49 = vpop.permute.xlu1 %78 }
  0xf3   :  { %v90_v52 = vperm.slane %v79_v49, %v89_v48 }
  0xfc   :  { %v76_v44 = vpop.permute.xlu2 %75 }
  0xfd   :  { %v88_v50 = vperm.slane %v76_v44, %v87_v47 }
  0xff   :  { %v92_v55 = vsel %vm91_vm1, %v90_v52, %v88_v50 }
 0x104   :  { %v82_v46 = vpop.permute.xlu2 %81 }
 0x105   :  { %v93_v53 = vperm.slane %v82_v46, %v87_v47 }
 0x10c   :  { %v85_v51 = vpop.permute.xlu2 %84 }
 0x10d   :  { %v94_v54 = vperm.slane %v85_v51, %v89_v48 }
 0x10f   :  { %v95_v56 = vsel %vm91_vm1, %v94_v54, %v93_v53 }
 0x110   :  { %v97_v57 = vsel %vm96_vm2, %v95_v56, %v92_v55 }
 0x111   :  { %100 = vst.msk [vmem:[%s158_s3] sm:$0x3] %vm99_vm3, %v97_v57 }

// kernel: ccdiscriminator_forward.6
= control target key start
LH: loop header
LB: loop body
LE: loop exit
PB: predicated region body
PF: predicated region fallthrough
CT: control target
= control target key end

     0   :  { %vm22_vm0 = vcmask 58368   ;;  %v288_v19 = vmov 0.0   ;;  %vm201_vm1 = vcmask 1024   ;;  %s374_s1 = inlined_call_operand.vmem [shape: bf16[256,8], index: 1, kind: input, shape index: {}]   ;;  %s375_s0 = inlined_call_operand.vmem [shape: bf16[2,256], index: 0, kind: input, shape index: {}]   ;;  %s376_s2 = inlined_call_operand.vmem [shape: f32[2,8], index: 2, kind: input, shape index: {}]   ;;  %s377_s3 = inlined_call_operand.<no memory space> [shape: f32[1,1], index: 3, kind: input, shape index: {}]   ;;  %s378_s4 = inlined_call_operand.vmem [shape: f32[2,1], index: 4, kind: output, shape index: {}]  }
   0x1   :  { %v278_v0 = vld [vmem:[%s374_s1 + $0x38] sm:$0xff]  ;;  %v277_v2 = vld [vmem:[%s374_s1 + $0x30] sm:$0xff]  ;;  %v25_v4 = vld [vmem:[%s375_s0] sm:$0x3]  ;;  %23 = vst.msk [vmem:[#allocation2] sm:$0x3] %vm22_vm0, %v288_v19  ;;  %v199_v31 = vstv %s377_s3 }
   0x2   :  { %v286_v1 = vld [vmem:[%s374_s1 + $0x78] sm:$0xff]  ;;  %160 = vmatpush.bf16.msra.mxu0 %v278_v0  ;;  %v285_v3 = vld [vmem:[%s374_s1 + $0x70] sm:$0xff]  ;;  %v276_v5 = vld [vmem:[%s374_s1 + $0x28] sm:$0xff]  ;;  %59 = vst [vmem:[#allocation1] ss:$9 sm:$0xff] %v25_v4 }
   0x3   :  { %173 = vmatpush.bf16.msra.mxu1 %v286_v1  ;;  %v284_v6 = vld [vmem:[%s374_s1 + $0x68] sm:$0xff]  ;;  %v275_v7 = vld [vmem:[%s374_s1 + $0x20] sm:$0xff]  ;;  %v274_v9 = vld [vmem:[%s374_s1 + $0x18] sm:$0xff] }
   0x4   :  { %v283_v8 = vld [vmem:[%s374_s1 + $0x60] sm:$0xff]  ;;  %v282_v10 = vld [vmem:[%s374_s1 + $0x58] sm:$0xff]  ;;  %v273_v11 = vld [vmem:[%s374_s1 + $0x10] sm:$0xff] }
   0x5   :  { %v281_v12 = vld [vmem:[%s374_s1 + $0x50] sm:$0xff]  ;;  %v272_v13 = vld [vmem:[%s374_s1 + $0x8] sm:$0xff]  ;;  %v271_v15 = vld [vmem:[%s374_s1] sm:$0xff] }
   0x6   :  { %161 = vmatpush.bf16.msra.mxu0 %v277_v2  ;;  %v280_v14 = vld [vmem:[%s374_s1 + $0x48] sm:$0xff]  ;;  %v279_v16 = vld [vmem:[%s374_s1 + $0x40] sm:$0xff] }
   0x7   :  { %174 = vmatpush.bf16.msra.mxu1 %v285_v3  ;;  %v194_v27 = vld [vmem:[%s376_s2] sm:$0x3] }
   0x8   :  { %v24_v22 = vld [vmem:[#allocation2] sm:$0x3] }
   0x9   :  { %v60_v17 = vld [vmem:[#allocation1] sm:$0xff]  ;;  %v61_v18 = vld [vmem:[#allocation1 + $0x9] sm:$0xff] }
   0xa   :  { %162 = vmatpush.bf16.msra.mxu0 %v276_v5 }
   0xb   :  { %175 = vmatpush.bf16.msra.mxu1 %v284_v6 }
   0xe   :  { %163 = vmatpush.bf16.msra.mxu0 %v275_v7 }
   0xf   :  { %176 = vmatpush.bf16.msra.mxu1 %v283_v8 }
  0x12   :  { %164 = vmatpush.bf16.msra.mxu0 %v274_v9 }
  0x13   :  { %177 = vmatpush.bf16.msra.mxu1 %v282_v10 }
  0x16   :  { %165 = vmatpush.bf16.msra.mxu0 %v273_v11 }
  0x17   :  { %178 = vmatpush.bf16.msra.mxu1 %v281_v12 }
  0x1a   :  { %166 = vmatpush.bf16.msra.mxu0 %v272_v13 }
  0x1b   :  { %179 = vmatpush.bf16.msra.mxu1 %v280_v14 }
  0x1e   :  { %167 = vmatpush.bf16.msra.mxu0 %v271_v15 }
  0x1f   :  { %180 = vmatpush.bf16.msra.mxu1 %v279_v16 }
  0x21   :  { %168 = vmatmul.bf16.vlgmr.msra.gmra.mxu0 %v60_v17 }
  0x22   :  { %181 = vmatmul.bf16.vlgmr.msra.gmra.mxu1 %v61_v18 }
  0x9e   :  { %v169_v20 = vpop.f32.mrf.mxu0 }
  0x9f   :  { %v182_v21 = vpop.f32.mrf.mxu1 }
  0xa0   :  { %v183_v23 = vadd.f32 %v182_v21, %v169_v20 }
  0xa2   :  { %v186_v24 = vadd.f32 %v183_v23, %v24_v22 }
  0xa4   :  { %188 = vst.msk [vmem:[#allocation2] sm:$0x3] %vm22_vm0, %v186_v24 }
  0xa6   :  { %v171_v25 = vpop.f32.mrf.mxu0 }
  0xa7   :  { %v184_v26 = vpop.f32.mrf.mxu1 }
  0xab   :  { %v193_v28 = vld [vmem:[#allocation2] sm:$0x3] }
  0xac   :  { %v195_v29 = vmul.f32 %v194_v27, %v193_v28 }
  0xae   :  { %v196_v30 = vsel %vm22_vm0, %v195_v29, 0.0 }
  0xaf   :  { %197 = vadd.xlane.f32.xlu0 %v196_v30 }
 0x122   :  { %v198_v32 = vpop.xlane.xlu0 %197 }
 0x123   :  { %v200_v33 = vmul.f32 %v199_v31, %v198_v32 }
 0x125   :  { %202 = vst.msk [vmem:[%s378_s4] sm:$0x3] %vm201_vm1, %v200_v33 }

</bundles_post_ra>
